<compile_context>
chip_gen: v7x
topology: tpu7x:2x2x1
jax: 0.10.0
libtpu: 0.0.40
codegen_flags: <defaults>
</compile_context>

<pallas_src>
import jax
import jax.numpy as jnp
from jax.experimental import pallas as pl
from jax.experimental.pallas import tpu as pltpu

_LANES = 128
_SUBLANES = 8


def _round_up(n, m):
    return ((n + m - 1) // m) * m


def _valid_bce_partial_kernel(x_ref, t_ref, v_ref, out_ref):
    x = x_ref[...].astype(jnp.float32)
    t = t_ref[...].astype(jnp.float32)
    v = v_ref[...].astype(jnp.float32)

    # Numerically stable BCE-with-logits (identical to PyTorch):
    #   loss = max(x, 0) - x*t + log1p(exp(-|x|))
    loss = jnp.maximum(x, 0.0) - x * t + jnp.log1p(jnp.exp(-jnp.abs(x)))
    masked = loss * v

    # (TB, 128) -> (TB//8, 8, 128) is a pure layout view; the sum over the leading axis is
    # elementwise VPU adds (no XLU cross-lane reduce, no serialized scalar RMW per step).
    tb = masked.shape[0]
    out_ref[...] = masked.reshape(tb // _SUBLANES, _SUBLANES, _LANES).sum(axis=0)


def _max_rows_per_block():
    """Generation-aware row block: 3 inputs x 2 pipeline buffers must fit a VMEM budget."""
    try:
        vmem_bytes = int(pltpu.get_tpu_info().vmem_capacity_bytes)
    except Exception:
        vmem_bytes = 64 * 1024 * 1024  # conservative fallback (v7x per-TC VMEM)
    budget = vmem_bytes // 4                    # generous headroom
    bytes_per_row = 3 * 2 * _LANES * 4          # 3 inputs, double-buffered, f32
    rows = min(2048, budget // bytes_per_row)
    return max(_SUBLANES, (rows // _SUBLANES) * _SUBLANES)


def valid_bce_loss(x, y):
    """Pallas TPU equivalent of ValidBCELoss: mean(BCEWithLogits(x, y['active']) * y['valid'])."""
    active = y["active"]
    valid = y["valid"]
    assert x.shape == active.shape == valid.shape

    n_true = x.size                              # .mean() divides by TOTAL element count
    xf = x.reshape(-1)
    tf = active.reshape(-1)
    vf = valid.reshape(-1)

    rows_needed = -(-n_true // _LANES)
    tb_max = _max_rows_per_block()
    num_blocks = -(-rows_needed // tb_max)
    # Spread rows evenly over the blocks to minimise padding waste.
    tb = _round_up(-(-rows_needed // num_blocks), _SUBLANES)
    rows_padded = num_blocks * tb
    pad = rows_padded * _LANES - n_true
    if pad:
        # Padding contributes 0 to the sum: `valid` is padded with zeros.
        xf = jnp.pad(xf, (0, pad))
        tf = jnp.pad(tf, (0, pad))
        vf = jnp.pad(vf, (0, pad))

    x2 = xf.reshape(rows_padded, _LANES)
    t2 = tf.reshape(rows_padded, _LANES)
    v2 = vf.reshape(rows_padded, _LANES)

    in_spec = pl.BlockSpec((tb, _LANES), lambda i: (i, 0))
    out_spec = pl.BlockSpec((_SUBLANES, _LANES), lambda i: (i, 0))

    itemsizes = x2.dtype.itemsize + t2.dtype.itemsize + v2.dtype.itemsize
    working_set = 2 * tb * _LANES * itemsizes + 2 * _SUBLANES * _LANES * 4
    vmem_limit = int(min(64 << 20, max(32 << 20, 2 * working_set)))

    partials = pl.pallas_call(
        _valid_bce_partial_kernel,
        out_shape=jax.ShapeDtypeStruct((num_blocks * _SUBLANES, _LANES), jnp.float32),
        grid_spec=pltpu.PrefetchScalarGridSpec(
            num_scalar_prefetch=0,
            grid=(num_blocks,),
            in_specs=[in_spec, in_spec, in_spec],
            out_specs=out_spec,
        ),
        compiler_params=pltpu.CompilerParams(
            dimension_semantics=("parallel",),   # per-block outputs -> v7x dual-TC shardable
            vmem_limit_bytes=vmem_limit,
        ),
    )(x2, t2, v2)

    # Tiny final reduce + divide (num_blocks * 8 * 128 floats) in plain JAX.
    return jnp.sum(partials) / jnp.float32(n_true)


def _reference(x, y):
    xf = x.astype(jnp.float32)
    t = y["active"].astype(jnp.float32)
    v = y["valid"].astype(jnp.float32)
    loss = jnp.maximum(xf, 0.0) - xf * t + jnp.log1p(jnp.exp(-jnp.abs(xf)))
    return jnp.mean(loss * v)


if __name__ == "__main__":
    key = jax.random.PRNGKey(0)
    k1, k2, k3 = jax.random.split(key, 3)

    # Small (batch, num_tasks) consistent with the module's (B, T) logits/targets/mask.
    B, T = 32, 128
    x = jax.random.normal(k1, (B, T), dtype=jnp.float32) * 2.0
    active = (jax.random.uniform(k2, (B, T)) > 0.5).astype(jnp.float32)
    valid = (jax.random.uniform(k3, (B, T)) > 0.3).astype(jnp.float32)
    y = {"active": active, "valid": valid}

    out = jax.block_until_ready(valid_bce_loss(x, y))
    ref = _reference(x, y)
    assert jnp.allclose(out, ref, rtol=1e-5, atol=1e-6), (out, ref)

    # Ragged shape: exercises zero-padding and the true-count divisor.
    B2, T2 = 7, 53
    k4, k5, k6 = jax.random.split(k3, 3)
    x2 = jax.random.normal(k4, (B2, T2), dtype=jnp.float32) * 2.0
    active2 = (jax.random.uniform(k5, (B2, T2)) > 0.5).astype(jnp.float32)
    valid2 = (jax.random.uniform(k6, (B2, T2)) > 0.3).astype(jnp.float32)
    y2 = {"active": active2, "valid": valid2}
    out2 = jax.block_until_ready(valid_bce_loss(x2, y2))
    ref2 = _reference(x2, y2)
    assert jnp.allclose(out2, ref2, rtol=1e-5, atol=1e-6), (out2, ref2)

    print("KERNEL_OK")
</pallas_src>

<mosaic_0001>
module attributes {stable_mosaic.version = 11 : i64} {
  func.func @_valid_bce_partial_kernel(%arg0: i32, %arg1: memref<32x128xf32, #tpu.memory_space<vmem>>, %arg2: memref<32x128xf32, #tpu.memory_space<vmem>>, %arg3: memref<32x128xf32, #tpu.memory_space<vmem>>, %arg4: memref<8x128xf32, #tpu.memory_space<vmem>>) attributes {dimension_semantics = [#tpu.dimension_semantics<parallel>], iteration_bounds = array<i64: 1>, scalar_prefetch = 0 : i64, scratch_operands = 0 : i64, tpu.core_type = #tpu.core_type<tc>, window_params = [{transform_indices = @transform_0, window_bounds = array<i64: 32, 128>}, {transform_indices = @transform_1, window_bounds = array<i64: 32, 128>}, {transform_indices = @transform_2, window_bounds = array<i64: 32, 128>}, {transform_indices = @transform_3, window_bounds = array<i64: 8, 128>}]} {
    %c0 = arith.constant 0 : index
    %c0_0 = arith.constant 0 : index
    %0 = vector.load %arg1[%c0, %c0_0] : memref<32x128xf32, #tpu.memory_space<vmem>>, vector<32x128xf32>
    %c0_1 = arith.constant 0 : index
    %c0_2 = arith.constant 0 : index
    %1 = vector.load %arg2[%c0_1, %c0_2] : memref<32x128xf32, #tpu.memory_space<vmem>>, vector<32x128xf32>
    %c0_3 = arith.constant 0 : index
    %c0_4 = arith.constant 0 : index
    %2 = vector.load %arg3[%c0_3, %c0_4] : memref<32x128xf32, #tpu.memory_space<vmem>>, vector<32x128xf32>
    %cst = arith.constant 0.000000e+00 : f32
    %3 = vector.broadcast %cst : f32 to vector<32x128xf32>
    %4 = arith.maximumf %0, %3 : vector<32x128xf32>
    %5 = arith.mulf %0, %1 : vector<32x128xf32>
    %6 = arith.subf %4, %5 : vector<32x128xf32>
    %7 = math.absf %0 : vector<32x128xf32>
    %cst_5 = arith.constant 0.000000e+00 : f32
    %8 = vector.broadcast %cst_5 : f32 to vector<32x128xf32>
    %9 = arith.subf %8, %7 : vector<32x128xf32>
    %10 = math.exp %9 : vector<32x128xf32>
    %11 = math.log1p %10 : vector<32x128xf32>
    %12 = arith.addf %6, %11 : vector<32x128xf32>
    %13 = arith.mulf %12, %2 : vector<32x128xf32>
    %14 = vector.shape_cast %13 : vector<32x128xf32> to vector<4x8x128xf32>
    %cst_6 = arith.constant dense<0.000000e+00> : vector<8x128xf32>
    %15 = vector.multi_reduction <add>, %14, %cst_6 [0] : vector<4x8x128xf32> to vector<8x128xf32>
    %c0_7 = arith.constant 0 : index
    %c0_8 = arith.constant 0 : index
    %16 = vector.load %arg4[%c0_7, %c0_8] : memref<8x128xf32, #tpu.memory_space<vmem>>, vector<8x128xf32>
    tpu.vector_store %arg4[%c0_7, %c0_8], %15 {strides = array<i32>} : memref<8x128xf32, #tpu.memory_space<vmem>>, vector<8x128xf32>,
    return
  }
  func.func @transform_0(%arg0: i32) -> (i32, i32) {
    %c0_i32 = arith.constant 0 : i32
    %c0_i32_0 = arith.constant 0 : i32
    return %arg0, %c0_i32 : i32, i32
  }
  func.func @transform_1(%arg0: i32) -> (i32, i32) {
    %c0_i32 = arith.constant 0 : i32
    %c0_i32_0 = arith.constant 0 : i32
    return %arg0, %c0_i32 : i32, i32
  }
  func.func @transform_2(%arg0: i32) -> (i32, i32) {
    %c0_i32 = arith.constant 0 : i32
    %c0_i32_0 = arith.constant 0 : i32
    return %arg0, %c0_i32 : i32, i32
  }
  func.func @transform_3(%arg0: i32) -> (i32, i32) {
    %c0_i32 = arith.constant 0 : i32
    %c0_i32_0 = arith.constant 0 : i32
    return %arg0, %c0_i32 : i32, i32
  }
}

</mosaic_0001>

<bundles_post_ra>
// kernel: tpu_custom_call.1
= control target key start
LH: loop header
LB: loop body
LE: loop exit
PB: predicated region body
PF: predicated region fallthrough
CT: control target
= control target key end

     0   :  { %8 = vsyncpa [#allocation3], 0  ;;  %s388_s0 = inlined_call_operand.hbm [shape: f32[32,128], index: 0, kind: input, shape index: {}]   ;;  %s389_s1 = inlined_call_operand.hbm [shape: f32[32,128], index: 1, kind: input, shape index: {}]   ;;  %s390_s2 = inlined_call_operand.hbm [shape: f32[32,128], index: 2, kind: input, shape index: {}]   ;;  %s391_s3 = inlined_call_operand.hbm [shape: f32[8,128], index: 3, kind: output, shape index: {}]  }
   0x1   :  { %9 = vsyncpa [#allocation6], 0 }
   0x2   :  { %10 = vsyncpa [#allocation4], 0  ;;  %s276_s12 = smov [#allocation5]   ;;  %s277_s14 = smov [#allocation2]  }
   0x3   :  { %s28_s13 = sshll.u32 %s276_s12, 4  ;;  %s16_s15 = sshll.u32 %s277_s14, 4  ;;  %s29_s13 = int_to_ptr.vmem [resolvable:$true] %s28_s13  ;;  %s302_s15 = int_to_ptr.vmem [resolvable:$true] %s16_s15 }
   0x4   :  { %s182_s18 = scalar_lea.hbm %s389_s1, 512 }
   0x5   :  { %p183_p0 = scmp.ne.s32.totalorder %s389_s1, %s182_s18  ;;  %p186_p1 = scmp.lt.u32.totalorder %s182_s18, %s389_s1 }
   0x7   :  { %p188_p2 = pnand %p186_p1, %p183_p0 }
   0x9   :  { %191 = shalt.err (!%p188_p2)
}
   0xa   :  { %s192_s23 = scalar_lea.vmem %s29_s13, 512  ;;  %p197_p4 = scmp.lt.s32.totalorder %s29_s13, %s29_s13 }
   0xb   :  { %p193_p3 = scmp.ne.s32.totalorder %s29_s13, %s192_s23  ;;  %p198_p5 = scmp.lt.s32.totalorder %s192_s23, %s192_s23 }
   0xd   :  { %p199_p6 = por %p198_p5, %p197_p4 }
   0xf   :  { %p200_p7 = pnand %p199_p6, %p193_p3 }
  0x11   :  { %203 = shalt.err (!%p200_p7)
}
  0x12   :  { %s278_s24 = smov 128   ;;  %s279_s25 = smov 8  }
  0x13   :  { %34 = dma.hbm_to_vmem [thread:$0]  %s389_s1, 512, %s29_s13, [#allocation6], %s278_s24, %s278_s24, %s279_s25  }
  0x14   :  { %s204_s30 = scalar_lea.hbm %s388_s0, 512 }
  0x15   :  { %p205_p8 = scmp.ne.s32.totalorder %s388_s0, %s204_s30  ;;  %p208_p9 = scmp.lt.u32.totalorder %s204_s30, %s388_s0 }
  0x17   :  { %p210_p10 = pnand %p208_p9, %p205_p8 }
  0x19   :  { %213 = shalt.err (!%p210_p10)
}
  0x1a   :  { %s214_s8 = scalar_lea.vmem %s302_s15, 512  ;;  %p219_p12 = scmp.lt.s32.totalorder %s302_s15, %s302_s15 }
  0x1b   :  { %p215_p11 = scmp.ne.s32.totalorder %s302_s15, %s214_s8  ;;  %p220_p13 = scmp.lt.s32.totalorder %s214_s8, %s214_s8 }
  0x1d   :  { %p221_p0 = por %p220_p13, %p219_p12 }
  0x1f   :  { %p222_p1 = pnand %p221_p0, %p215_p11 }
  0x21   :  { %225 = shalt.err (!%p222_p1)
}
  0x22   :  { %22 = dma.hbm_to_vmem [thread:$0]  %s388_s0, 512, %s302_s15, [#allocation3], %s278_s24, %s278_s24, %s279_s25  }
  0x23   :  { %s280_s10 = smov [#allocation7]   ;;  %s226_s14 = scalar_lea.hbm %s390_s2, 512 }
  0x24   :  { %s40_s11 = sshll.u32 %s280_s10, 4  ;;  %p227_p2 = scmp.ne.s32.totalorder %s390_s2, %s226_s14  ;;  %s41_s11 = int_to_ptr.vmem [resolvable:$true] %s40_s11 }
  0x25   :  { %p230_p3 = scmp.lt.u32.totalorder %s226_s14, %s390_s2 }
  0x27   :  { %p232_p4 = pnand %p230_p3, %p227_p2 }
  0x29   :  { %235 = shalt.err (!%p232_p4)
}
  0x2a   :  { %s236_s20 = scalar_lea.vmem %s41_s11, 512  ;;  %p241_p6 = scmp.lt.s32.totalorder %s41_s11, %s41_s11 }
  0x2b   :  { %p237_p5 = scmp.ne.s32.totalorder %s41_s11, %s236_s20  ;;  %p242_p7 = scmp.lt.s32.totalorder %s236_s20, %s236_s20 }
  0x2d   :  { %p243_p8 = por %p242_p7, %p241_p6 }
  0x2f   :  { %p244_p9 = pnand %p243_p8, %p237_p5 }
  0x31   :  { %247 = shalt.err (!%p244_p9)
}
  0x32   :  { %46 = dma.hbm_to_vmem [thread:$0]  %s390_s2, 512, %s41_s11, [#allocation6], %s278_s24, %s278_s24, %s279_s25  }
  0x33   :  { %270 = dma.done.wait [#allocation3], 512  }
  0x34   :  { %271 = vsyncadd [#allocation3], 4294966784 }
  0x35   :  { %272 = dma.done.wait [#allocation6], 1024  }
  0x36   :  { %273 = vsyncadd [#allocation6], 4294966272  ;;  %v56_v0 = vld [vmem:[#allocation2] sm:$0xff]  ;;  %v57_v1 = vld [vmem:[#allocation2 + $0x8] sm:$0xff]  ;;  %s281_s2 = smov [#allocation8]  }
  0x37   :  { %v354_v2 = vld [vmem:[#allocation2 + $0x10] sm:$0xff]  ;;  %v356_v3 = vld [vmem:[#allocation2 + $0x18] sm:$0xff]  ;;  %v80_v4 = vand.u32 2147483647, %v56_v0  ;;  %v81_v5 = vand.u32 2147483647, %v57_v1 }
  0x38   :  { %v82_v6 = vand.u32 2147483647, %v354_v2  ;;  %v83_v7 = vand.u32 2147483647, %v356_v3  ;;  %v60_v26 = vld [vmem:[#allocation5] sm:$0xff]  ;;  %v61_v28 = vld [vmem:[#allocation5 + $0x8] sm:$0xff] }
  0x39   :  { %v84_v8 = vsub.f32 0.0, %v80_v4  ;;  %v85_v9 = vsub.f32 0.0, %v81_v5  ;;  %v62_v29 = vld [vmem:[#allocation5 + $0x10] sm:$0xff]  ;;  %v63_v32 = vld [vmem:[#allocation5 + $0x18] sm:$0xff]  ;;  %v68_v33 = vmax.f32 %v56_v0, 0.0  ;;  %v72_v34 = vmul.f32 %v60_v26, %v56_v0  ;;  %v64_v61 = vld [vmem:[#allocation7] sm:$0xff] }
  0x3a   :  { %v86_v10 = vsub.f32 0.0, %v82_v6  ;;  %v87_v11 = vsub.f32 0.0, %v83_v7  ;;  %v69_v37 = vmax.f32 %v57_v1, 0.0  ;;  %v73_v38 = vmul.f32 %v61_v28, %v57_v1  ;;  %v66_v6 = vld [vmem:[#allocation7 + $0x10] sm:$0xff]  ;;  %s150_s21 = sshll.u32 %s281_s2, 4  ;;  %s151_s21 = int_to_ptr.vmem [resolvable:$true] %s150_s21 }
  0x3b   :  { %v88_v12 = vmul.f32 1.442695, %v84_v8  ;;  %v90_v13 = vmul.f32 1.442695, %v85_v9  ;;  %v70_v41 = vmax.f32 %v354_v2, 0.0  ;;  %v74_v42 = vmul.f32 %v62_v29, %v354_v2  ;;  %v65_v2 = vld [vmem:[#allocation7 + $0x8] sm:$0xff]  ;;  %p253_p11 = scmp.lt.s32.totalorder %s151_s21, %s151_s21 }
  0x3c   :  { %v92_v14 = vmul.f32 1.442695, %v86_v10  ;;  %v94_v15 = vmul.f32 1.442695, %v87_v11  ;;  %v71_v44 = vmax.f32 %v356_v3, 0.0  ;;  %v75_v45 = vmul.f32 %v63_v32, %v356_v3  ;;  %s248_s22 = scalar_lea.vmem %s151_s21, 128 }
  0x3d   :  { %166 = vpow2.f32 %v88_v12  ;;  %v76_v49 = vsub.f32 %v68_v33, %v72_v34  ;;  %v77_v54 = vsub.f32 %v69_v37, %v73_v38  ;;  %v78_v59 = vsub.f32 %v70_v41, %v74_v42  ;;  %v67_v12 = vld [vmem:[#allocation7 + $0x18] sm:$0xff]  ;;  %p249_p10 = scmp.ne.s32.totalorder %s151_s21, %s248_s22  ;;  %p254_p12 = scmp.lt.s32.totalorder %s248_s22, %s248_s22 }
  0x3e   :  { %168 = vpow2.f32 %v90_v13  ;;  %v79_v3 = vsub.f32 %v71_v44, %v75_v45 }
  0x3f   :  { %170 = vpow2.f32 %v92_v14  ;;  %p255_p13 = por %p254_p12, %p253_p11 }
  0x40   :  { %172 = vpow2.f32 %v94_v15 }
  0x41   :  { %p256_p0 = pnand %p255_p13, %p249_p10 }
  0x47   :  { %v167_v16 = vpop.eup %166 }
  0x48   :  { %v169_v17 = vpop.eup %168  ;;  %v96_v18 = vadd.f32 1.0, %v167_v16  ;;  %v99_v23 = vmul.f32 -0.5, %v167_v16  ;;  %v102_v35 = vand.u32 2147483647, %v167_v16 }
  0x49   :  { %v171_v19 = vpop.eup %170  ;;  %v105_v20 = vadd.f32 1.0, %v169_v17  ;;  %v108_v24 = vmul.f32 -0.5, %v169_v17  ;;  %v111_v39 = vand.u32 2147483647, %v169_v17 }
  0x4a   :  { %v173_v21 = vpop.eup %172  ;;  %174 = vlog2.f32 %v96_v18  ;;  %v114_v22 = vadd.f32 1.0, %v171_v19  ;;  %v117_v27 = vmul.f32 -0.5, %v171_v19  ;;  %v100_v30 = vadd.f32 1.0, %v99_v23 }
  0x4b   :  { %176 = vlog2.f32 %v105_v20  ;;  %v123_v25 = vadd.f32 1.0, %v173_v21  ;;  %v126_v31 = vmul.f32 -0.5, %v173_v21  ;;  %v109_v36 = vadd.f32 1.0, %v108_v24 }
  0x4c   :  { %178 = vlog2.f32 %v114_v22  ;;  %v118_v40 = vadd.f32 1.0, %v117_v27  ;;  %v120_v43 = vand.u32 2147483647, %v171_v19  ;;  %v101_v46 = vmul.f32 %v167_v16, %v100_v30 }
  0x4d   :  { %180 = vlog2.f32 %v123_v25  ;;  %v127_v47 = vadd.f32 1.0, %v126_v31  ;;  %vm364_vm0 = vcmp.lt.f32.partialorder %v102_v35, 0.0004427343  ;;  %v110_v51 = vmul.f32 %v169_v17, %v109_v36 }
  0x4e   :  { %v129_v52 = vand.u32 2147483647, %v173_v21  ;;  %vm368_vm1 = vcmp.lt.f32.partialorder %v111_v39, 0.0004427343  ;;  %v119_v57 = vmul.f32 %v171_v19, %v118_v40  ;;  %vm121_vm2 = vcmp.lt.f32.partialorder %v120_v43, 0.0004427343 }
  0x4f   :  { %v128_v0 = vmul.f32 %v173_v21, %v127_v47 }
  0x50   :  { %vm130_vm3 = vcmp.lt.f32.partialorder %v129_v52, 0.0004427343 }
  0x54   :  { %v175_v48 = vpop.eup %174 }
  0x55   :  { %v177_v53 = vpop.eup %176  ;;  %v98_v55 = vmul.f32 0.6931472, %v175_v48 }
  0x56   :  { %v179_v58 = vpop.eup %178  ;;  %v107_v60 = vmul.f32 0.6931472, %v177_v53 }
  0x57   :  { %v104_v62 = vsel %vm364_vm0, %v101_v46, %v98_v55  ;;  %v116_v63 = vmul.f32 0.6931472, %v179_v58  ;;  %v181_v1 = vpop.eup %180 }
  0x58   :  { %v113_v4 = vsel %vm368_vm1, %v110_v51, %v107_v60  ;;  %v132_v5 = vadd.f32 %v104_v62, %v76_v49  ;;  %v125_v8 = vmul.f32 0.6931472, %v181_v1 }
  0x59   :  { %v122_v7 = vsel %vm121_vm2, %v119_v57, %v116_v63  ;;  %v133_v9 = vadd.f32 %v113_v4, %v77_v54 }
  0x5a   :  { %v134_v10 = vadd.f32 %v122_v7, %v78_v59  ;;  %v136_v11 = vmul.f32 %v132_v5, %v64_v61  ;;  %v131_v13 = vsel %vm130_vm3, %v128_v0, %v125_v8 }
  0x5b   :  { %v137_v14 = vmul.f32 %v133_v9, %v65_v2  ;;  %v135_v15 = vadd.f32 %v131_v13, %v79_v3 }
  0x5c   :  { %v138_v16 = vmul.f32 %v134_v10, %v66_v6 }
  0x5d   :  { %v140_v17 = vadd.f32 %v137_v14, %v136_v11  ;;  %v139_v18 = vmul.f32 %v135_v15, %v67_v12 }
  0x5f   :  { %v141_v19 = vadd.f32 %v140_v17, %v138_v16 }
  0x61   :  { %v142_v20 = vadd.f32 %v141_v19, %v139_v18 }
  0x63   :  { %143 = vst [vmem:[#allocation8] sm:$0xff] %v142_v20 }
  0x64   :  { %259 = shalt.err (!%p256_p0)
}
  0x65   :  { %s260_s25 = scalar_lea.hbm %s391_s3, 128 }
  0x66   :  { %p261_p1 = scmp.ne.s32.totalorder %s391_s3, %s260_s25  ;;  %p264_p2 = scmp.lt.u32.totalorder %s260_s25, %s391_s3 }
  0x68   :  { %p266_p3 = pnand %p264_p2, %p261_p1 }
  0x6a   :  { %269 = shalt.err (!%p266_p3)
}
  0x6b   :  { %153 = dma.vmem_to_hbm [thread:$0]  %s151_s21, 128, %s391_s3, [#allocation4]  }
  0x6c   :  { %274 = dma.done.wait [#allocation4], 128  }
  0x6d   :  { %275 = vsyncadd [#allocation4], 4294967168 }
  0x6e   :  { %157 = vsyncpa [#allocation3], 1 }
  0x6f   :  { %158 = vsyncpa [#allocation6], 1 }
  0x70   :  { %159 = vsyncpa [#allocation4], 1 }

</bundles_post_ra>
